<compile_context>
chip_gen: v7x
topology: tpu7x:2x2x1
jax: 0.10.0
libtpu: 0.0.40
codegen_flags: <defaults>
</compile_context>

<pallas_src>
import functools

import jax
import jax.numpy as jnp
from jax.experimental import pallas as pl
from jax.experimental.pallas import tpu as pltpu

IN_DIM = 200     # encoder input features (40 nt * 5-way one-hot)
ENC_DIM = 100    # encoder latent size (fixed by classifier's Linear(100, 50))
H1 = 50
H2 = 50
OUT_DIM = 1

MAX_TB = 8192    # rows per grid step (x tile: 3.2 MiB bf16 / 6.25 MiB f32)
CHUNK = 512      # rows per in-kernel compute chunk (bounds live-value footprint)

# Contract the last dim of both operands (the splash-attention q@k^T pattern):
# (1, K) x (C, K) -> (1, C), i.e. w3_row @ h2^T without materializing h2^T.
_NT_DIMS = (((1,), (1,)), ((), ()))


def _round_up(n, m):
    return ((n + m - 1) // m) * m


def _ann_kernel(x_ref,
                we_ref, be_ref,      # encoder Linear(200 -> 100)
                w1_ref, b1_ref,      # classifier Linear(100 -> 50)
                w2_ref, b2_ref,      # classifier Linear(50  -> 50)
                w3r_ref, b3_ref,     # classifier Linear(50  -> 1), weight as (1, 50)
                out_ref,             # (1, 1, TB) lane-dense output row
                *, chunk):
    tb = x_ref.shape[0]
    n_chunks = tb // chunk           # static; TB is always a multiple of chunk

    for c in range(n_chunks):        # static unroll; all slice starts compile-time
        r0 = c * chunk

        # Per-chunk load + cast in VMEM (no wrapper-side cast pass over x).
        xb = x_ref[r0:r0 + chunk, :].astype(jnp.bfloat16)            # (C, 200)

        # encoder: Linear(200 -> 100) + ReLU
        h = jnp.dot(xb, we_ref[...],
                    preferred_element_type=jnp.float32) + be_ref[...]
        h = jnp.maximum(h, 0.0).astype(jnp.bfloat16)                 # (C, 100)

        # classifier layer 1: Linear(100 -> 50) + ReLU
        h = jnp.dot(h, w1_ref[...],
                    preferred_element_type=jnp.float32) + b1_ref[...]
        h = jnp.maximum(h, 0.0).astype(jnp.bfloat16)                 # (C, 50)

        # classifier layer 2: Linear(50 -> 50) + ReLU
        h = jnp.dot(h, w2_ref[...],
                    preferred_element_type=jnp.float32) + b2_ref[...]
        h = jnp.maximum(h, 0.0).astype(jnp.bfloat16)                 # (C, 50)

        # classifier layer 3: Linear(50 -> 1) as NT matmul -> lane-dense (1, C)
        y = jax.lax.dot_general(w3r_ref[...], h, _NT_DIMS,
                                preferred_element_type=jnp.float32)  # (1, C)
        y = y + b3_ref[...]                                          # + b3 (1,1)

        out_ref[0, :, r0:r0 + chunk] = y


def ann_forward(x, params, *, max_tb=MAX_TB, chunk=CHUNK):
    """x: (B, IN_DIM), f32 or bf16 (bf16 preferred: halves the HBM stream).

    params: dict of (in, out) weights and (1, out) biases (f32).
    Returns (B, OUT_DIM) f32 logits.
    """
    B = x.shape[0]
    assert x.shape[1] == IN_DIM, x.shape

    # Tile selection: TB is a multiple of the in-kernel chunk; no whole-array
    # padding of x — Pallas handles the ragged final block, and the garbage
    # tail rows are sliced off below (row-wise independent compute).
    if B <= chunk:
        TB = max(8, _round_up(B, 8))
        chunk = TB
    else:
        TB = min(_round_up(max_tb, chunk), _round_up(B, chunk))
    num_tiles = pl.cdiv(B, TB)

    # bf16 weights (native MXU dtype, ~60 KB resident); f32 biases.
    weights = (
        params["we"].astype(jnp.bfloat16), params["be"].astype(jnp.float32),
        params["w1"].astype(jnp.bfloat16), params["b1"].astype(jnp.float32),
        params["w2"].astype(jnp.bfloat16), params["b2"].astype(jnp.float32),
        params["w3"].T.astype(jnp.bfloat16),            # (1, 50) row for NT matmul
        params["b3"].astype(jnp.float32),               # (1, 1)
    )

    resident = lambda i: (0, 0)                         # constant index_map: no re-DMA
    in_specs = [pl.BlockSpec((TB, IN_DIM), lambda i: (i, 0))]
    in_specs += [pl.BlockSpec(w.shape, resident) for w in weights]

    out = pl.pallas_call(
        functools.partial(_ann_kernel, chunk=chunk),
        out_shape=jax.ShapeDtypeStruct((num_tiles, 1, TB), jnp.float32),
        grid=(num_tiles,),
        in_specs=in_specs,
        out_specs=pl.BlockSpec((1, 1, TB), lambda i: (i, 0, 0)),
        compiler_params=pltpu.CompilerParams(
            # TODO(synk): on v7x, check the 2nd TensorCore is busy; if not,
            # switch this axis to pltpu.CORE_PARALLEL.
            dimension_semantics=("parallel",),
            vmem_limit_bytes=32 * 1024 * 1024,          # covers v5e 16 MiB default
        ),
    )(x, *weights)

    # (num_tiles, 1, TB) lane-dense slab -> (B, 1) logits (tail rows dropped).
    return out.reshape(num_tiles * TB)[:B].reshape(B, OUT_DIM)


def init_params(key):
    """Deterministic synthetic parameters (uniform, PyTorch-Linear-like scale)."""
    def linear(key, fan_in, fan_out):
        kw, kb = jax.random.split(key)
        bound = 1.0 / jnp.sqrt(fan_in)
        w = jax.random.uniform(kw, (fan_in, fan_out), jnp.float32, -bound, bound)
        b = jax.random.uniform(kb, (1, fan_out), jnp.float32, -bound, bound)
        return w, b

    k0, k1, k2, k3 = jax.random.split(key, 4)
    we, be = linear(k0, IN_DIM, ENC_DIM)
    w1, b1 = linear(k1, ENC_DIM, H1)
    w2, b2 = linear(k2, H1, H2)
    w3, b3 = linear(k3, H2, OUT_DIM)
    return dict(we=we, be=be, w1=w1, b1=b1, w2=w2, b2=b2, w3=w3, b3=b3)


def ann_reference(x, p):
    """Pure-JAX reference using the same bf16-in / f32-accumulate recipe."""
    def lin(h, w, b):
        return jnp.dot(h.astype(jnp.bfloat16), w.astype(jnp.bfloat16),
                       preferred_element_type=jnp.float32) + b
    h = jnp.maximum(lin(x, p["we"], p["be"]), 0.0)
    h = jnp.maximum(lin(h, p["w1"], p["b1"]), 0.0)
    h = jnp.maximum(lin(h, p["w2"], p["b2"]), 0.0)
    return lin(h, p["w3"], p["b3"])


if __name__ == "__main__":
    key = jax.random.PRNGKey(0)
    kx, kp = jax.random.split(key)

    B = 8
    x = jax.random.normal(kx, (B, IN_DIM), jnp.float32)
    params = init_params(kp)

    out = ann_forward(x, params)
    out = jax.block_until_ready(out)

    ref = ann_reference(x, params)
    assert out.shape == (B, OUT_DIM), out.shape
    assert jnp.allclose(out, ref, atol=1e-3, rtol=1e-3), (
        float(jnp.max(jnp.abs(out - ref))))

    print("KERNEL_OK")
</pallas_src>

<mosaic_0001>
module attributes {stable_mosaic.version = 11 : i64} {
  func.func @_ann_kernel(%arg0: i32, %arg1: memref<8x200xf32, #tpu.memory_space<vmem>>, %arg2: memref<200x100xbf16, #tpu.memory_space<vmem>>, %arg3: memref<1x100xf32, #tpu.memory_space<vmem>>, %arg4: memref<100x50xbf16, #tpu.memory_space<vmem>>, %arg5: memref<1x50xf32, #tpu.memory_space<vmem>>, %arg6: memref<50x50xbf16, #tpu.memory_space<vmem>>, %arg7: memref<1x50xf32, #tpu.memory_space<vmem>>, %arg8: memref<1x50xbf16, #tpu.memory_space<vmem>>, %arg9: memref<1x1xf32, #tpu.memory_space<vmem>>, %arg10: memref<1x1x8xf32, #tpu.memory_space<vmem>>) attributes {dimension_semantics = [#tpu.dimension_semantics<parallel>], iteration_bounds = array<i64: 1>, scalar_prefetch = 0 : i64, scratch_operands = 0 : i64, tpu.core_type = #tpu.core_type<tc>, window_params = [{transform_indices = @transform_0, window_bounds = array<i64: 8, 200>}, {pipeline_mode = #tpu.pipeline_mode<synchronous>, transform_indices = @transform_1, window_bounds = array<i64: 200, 100>}, {pipeline_mode = #tpu.pipeline_mode<synchronous>, transform_indices = @transform_2, window_bounds = array<i64: 1, 100>}, {pipeline_mode = #tpu.pipeline_mode<synchronous>, transform_indices = @transform_3, window_bounds = array<i64: 100, 50>}, {pipeline_mode = #tpu.pipeline_mode<synchronous>, transform_indices = @transform_4, window_bounds = array<i64: 1, 50>}, {pipeline_mode = #tpu.pipeline_mode<synchronous>, transform_indices = @transform_5, window_bounds = array<i64: 50, 50>}, {pipeline_mode = #tpu.pipeline_mode<synchronous>, transform_indices = @transform_6, window_bounds = array<i64: 1, 50>}, {pipeline_mode = #tpu.pipeline_mode<synchronous>, transform_indices = @transform_7, window_bounds = array<i64: 1, 50>}, {pipeline_mode = #tpu.pipeline_mode<synchronous>, transform_indices = @transform_8, window_bounds = array<i64: 1, 1>}, {transform_indices = @transform_9, window_bounds = array<i64: 1, 1, 8>}]} {
    %c0 = arith.constant 0 : index
    %c0_0 = arith.constant 0 : index
    %0 = vector.load %arg1[%c0, %c0_0] : memref<8x200xf32, #tpu.memory_space<vmem>>, vector<8x200xf32>
    %1 = arith.truncf %0 : vector<8x200xf32> to vector<8x200xbf16>
    %c0_1 = arith.constant 0 : index
    %c0_2 = arith.constant 0 : index
    %2 = vector.load %arg2[%c0_1, %c0_2] : memref<200x100xbf16, #tpu.memory_space<vmem>>, vector<200x100xbf16>
    %cst = arith.constant dense<0.000000e+00> : vector<8x100xf32>
    %3 = tpu.matmul %1, %2, %cst {dimension_numbers = #tpu.dot_dimension_numbers<[1], [0], [0], [1], [0, 0, 1, 1], [], []>} : vector<8x200xbf16>, vector<200x100xbf16>, vector<8x100xf32> -> vector<8x100xf32>
    %c0_3 = arith.constant 0 : index
    %c0_4 = arith.constant 0 : index
    %4 = vector.load %arg3[%c0_3, %c0_4] : memref<1x100xf32, #tpu.memory_space<vmem>>, vector<1x100xf32>
    %5 = vector.broadcast %4 : vector<1x100xf32> to vector<8x100xf32>
    %6 = arith.addf %3, %5 : vector<8x100xf32>
    %cst_5 = arith.constant 0.000000e+00 : f32
    %7 = vector.broadcast %cst_5 : f32 to vector<8x100xf32>
    %8 = arith.maximumf %6, %7 : vector<8x100xf32>
    %9 = arith.truncf %8 : vector<8x100xf32> to vector<8x100xbf16>
    %c0_6 = arith.constant 0 : index
    %c0_7 = arith.constant 0 : index
    %10 = vector.load %arg4[%c0_6, %c0_7] : memref<100x50xbf16, #tpu.memory_space<vmem>>, vector<100x50xbf16>
    %cst_8 = arith.constant dense<0.000000e+00> : vector<8x50xf32>
    %11 = tpu.matmul %9, %10, %cst_8 {dimension_numbers = #tpu.dot_dimension_numbers<[1], [0], [0], [1], [0, 0, 1, 1], [], []>} : vector<8x100xbf16>, vector<100x50xbf16>, vector<8x50xf32> -> vector<8x50xf32>
    %c0_9 = arith.constant 0 : index
    %c0_10 = arith.constant 0 : index
    %12 = vector.load %arg5[%c0_9, %c0_10] : memref<1x50xf32, #tpu.memory_space<vmem>>, vector<1x50xf32>
    %13 = vector.broadcast %12 : vector<1x50xf32> to vector<8x50xf32>
    %14 = arith.addf %11, %13 : vector<8x50xf32>
    %cst_11 = arith.constant 0.000000e+00 : f32
    %15 = vector.broadcast %cst_11 : f32 to vector<8x50xf32>
    %16 = arith.maximumf %14, %15 : vector<8x50xf32>
    %17 = arith.truncf %16 : vector<8x50xf32> to vector<8x50xbf16>
    %c0_12 = arith.constant 0 : index
    %c0_13 = arith.constant 0 : index
    %18 = vector.load %arg6[%c0_12, %c0_13] : memref<50x50xbf16, #tpu.memory_space<vmem>>, vector<50x50xbf16>
    %cst_14 = arith.constant dense<0.000000e+00> : vector<8x50xf32>
    %19 = tpu.matmul %17, %18, %cst_14 {dimension_numbers = #tpu.dot_dimension_numbers<[1], [0], [0], [1], [0, 0, 1, 1], [], []>} : vector<8x50xbf16>, vector<50x50xbf16>, vector<8x50xf32> -> vector<8x50xf32>
    %c0_15 = arith.constant 0 : index
    %c0_16 = arith.constant 0 : index
    %20 = vector.load %arg7[%c0_15, %c0_16] : memref<1x50xf32, #tpu.memory_space<vmem>>, vector<1x50xf32>
    %21 = vector.broadcast %20 : vector<1x50xf32> to vector<8x50xf32>
    %22 = arith.addf %19, %21 : vector<8x50xf32>
    %cst_17 = arith.constant 0.000000e+00 : f32
    %23 = vector.broadcast %cst_17 : f32 to vector<8x50xf32>
    %24 = arith.maximumf %22, %23 : vector<8x50xf32>
    %25 = arith.truncf %24 : vector<8x50xf32> to vector<8x50xbf16>
    %c0_18 = arith.constant 0 : index
    %c0_19 = arith.constant 0 : index
    %26 = vector.load %arg8[%c0_18, %c0_19] : memref<1x50xbf16, #tpu.memory_space<vmem>>, vector<1x50xbf16>
    %cst_20 = arith.constant dense<0.000000e+00> : vector<1x8xf32>
    %27 = tpu.matmul %26, %25, %cst_20 {dimension_numbers = #tpu.dot_dimension_numbers<[1], [1], [0], [0], [0, 0, 1, 0], [], []>} : vector<1x50xbf16>, vector<8x50xbf16>, vector<1x8xf32> -> vector<1x8xf32>
    %c0_21 = arith.constant 0 : index
    %c0_22 = arith.constant 0 : index
    %28 = vector.load %arg9[%c0_21, %c0_22] : memref<1x1xf32, #tpu.memory_space<vmem>>, vector<1x1xf32>
    %29 = vector.broadcast %28 : vector<1x1xf32> to vector<1x8xf32>
    %30 = arith.addf %27, %29 : vector<1x8xf32>
    %c0_23 = arith.constant 0 : index
    %c0_24 = arith.constant 0 : index
    %c0_25 = arith.constant 0 : index
    %31 = vector.load %arg10[%c0_23, %c0_24, %c0_25] : memref<1x1x8xf32, #tpu.memory_space<vmem>>, vector<1x1x8xf32>
    %32 = vector.shape_cast %31 : vector<1x1x8xf32> to vector<1x8xf32>
    %33 = vector.shape_cast %30 : vector<1x8xf32> to vector<1x1x8xf32>
    tpu.vector_store %arg10[%c0_23, %c0_24, %c0_25], %33 {strides = array<i32>} : memref<1x1x8xf32, #tpu.memory_space<vmem>>, vector<1x1x8xf32>,
    return
  }
  func.func @transform_0(%arg0: i32) -> (i32, i32) {
    %c0_i32 = arith.constant 0 : i32
    %c0_i32_0 = arith.constant 0 : i32
    return %arg0, %c0_i32 : i32, i32
  }
  func.func @transform_1(%arg0: i32) -> (i32, i32) {
    %c0_i32 = arith.constant 0 : i32
    %c0_i32_0 = arith.constant 0 : i32
    %c0_i32_1 = arith.constant 0 : i32
    return %c0_i32, %c0_i32_0 : i32, i32
  }
  func.func @transform_2(%arg0: i32) -> (i32, i32) {
    %c0_i32 = arith.constant 0 : i32
    %c0_i32_0 = arith.constant 0 : i32
    %c0_i32_1 = arith.constant 0 : i32
    return %c0_i32, %c0_i32_0 : i32, i32
  }
  func.func @transform_3(%arg0: i32) -> (i32, i32) {
    %c0_i32 = arith.constant 0 : i32
    %c0_i32_0 = arith.constant 0 : i32
    %c0_i32_1 = arith.constant 0 : i32
    return %c0_i32, %c0_i32_0 : i32, i32
  }
  func.func @transform_4(%arg0: i32) -> (i32, i32) {
    %c0_i32 = arith.constant 0 : i32
    %c0_i32_0 = arith.constant 0 : i32
    %c0_i32_1 = arith.constant 0 : i32
    return %c0_i32, %c0_i32_0 : i32, i32
  }
  func.func @transform_5(%arg0: i32) -> (i32, i32) {
    %c0_i32 = arith.constant 0 : i32
    %c0_i32_0 = arith.constant 0 : i32
    %c0_i32_1 = arith.constant 0 : i32
    return %c0_i32, %c0_i32_0 : i32, i32
  }
  func.func @transform_6(%arg0: i32) -> (i32, i32) {
    %c0_i32 = arith.constant 0 : i32
    %c0_i32_0 = arith.constant 0 : i32
    %c0_i32_1 = arith.constant 0 : i32
    return %c0_i32, %c0_i32_0 : i32, i32
  }
  func.func @transform_7(%arg0: i32) -> (i32, i32) {
    %c0_i32 = arith.constant 0 : i32
    %c0_i32_0 = arith.constant 0 : i32
    %c0_i32_1 = arith.constant 0 : i32
    return %c0_i32, %c0_i32_0 : i32, i32
  }
  func.func @transform_8(%arg0: i32) -> (i32, i32) {
    %c0_i32 = arith.constant 0 : i32
    %c0_i32_0 = arith.constant 0 : i32
    %c0_i32_1 = arith.constant 0 : i32
    return %c0_i32, %c0_i32_0 : i32, i32
  }
  func.func @transform_9(%arg0: i32) -> (i32, i32, i32) {
    %c0_i32 = arith.constant 0 : i32
    %c0_i32_0 = arith.constant 0 : i32
    %c0_i32_1 = arith.constant 0 : i32
    return %arg0, %c0_i32, %c0_i32_0 : i32, i32, i32
  }
}

</mosaic_0001>

<bundles_post_ra>
// kernel: tpu_custom_call.1
= control target key start
LH: loop header
LB: loop body
LE: loop exit
PB: predicated region body
PF: predicated region fallthrough
CT: control target
= control target key end

     0   :  { %s797_s0 = inlined_call_operand.vmem [shape: f32[8,200], index: 0, kind: input, shape index: {}]   ;;  %s798_s1 = inlined_call_operand.hbm [shape: bf16[200,100], index: 1, kind: input, shape index: {}]   ;;  %s799_s2 = inlined_call_operand.vmem [shape: f32[1,100], index: 2, kind: input, shape index: {}]   ;;  %s800_s3 = inlined_call_operand.vmem [shape: bf16[100,50], index: 3, kind: input, shape index: {}]   ;;  %s801_s4 = inlined_call_operand.vmem [shape: f32[1,50], index: 4, kind: input, shape index: {}]   ;;  %s802_s5 = inlined_call_operand.vmem [shape: bf16[50,50], index: 5, kind: input, shape index: {}]   ;;  %s803_s6 = inlined_call_operand.vmem [shape: f32[1,50], index: 6, kind: input, shape index: {}]   ;;  %s804_s7 = inlined_call_operand.vmem [shape: bf16[1,50], index: 7, kind: input, shape index: {}]   ;;  %s805_s8 = inlined_call_operand.<no memory space> [shape: f32[1,1], index: 8, kind: input, shape index: {}]   ;;  %s806_s9 = inlined_call_operand.hbm [shape: f32[1,1,8], index: 9, kind: output, shape index: {}]  }
   0x1   :  { %v14_v0 = vstv %s805_s8 }
   0x2   :  { %15 = vst [vmem:[#allocation2] sm:$0x1] %v14_v0 }
   0x3   :  { %16 = vsyncpa [#allocation4], 0 }
   0x4   :  { %17 = vsyncpa [#allocation5], 0  ;;  %s641_s11 = smov [#allocation3]   ;;  %s593_s15 = scalar_lea.hbm %s798_s1, 1600 }
   0x5   :  { %s25_s12 = sshll.u32 %s641_s11, 4  ;;  %p594_p0 = scmp.ne.s32.totalorder %s798_s1, %s593_s15  ;;  %s26_s12 = int_to_ptr.vmem [resolvable:$true] %s25_s12 }
   0x6   :  { %p597_p1 = scmp.lt.u32.totalorder %s593_s15, %s798_s1 }
   0x8   :  { %p599_p2 = pnand %p597_p1, %p594_p0 }
   0xa   :  { %602 = shalt.err (!%p599_p2)
}
   0xb   :  { %s603_s8 = scalar_lea.vmem %s26_s12, 1600  ;;  %p608_p4 = scmp.lt.s32.totalorder %s26_s12, %s26_s12 }
   0xc   :  { %p604_p3 = scmp.ne.s32.totalorder %s26_s12, %s603_s8  ;;  %p609_p5 = scmp.lt.s32.totalorder %s603_s8, %s603_s8 }
   0xe   :  { %p610_p6 = por %p609_p5, %p608_p4 }
  0x10   :  { %p611_p7 = pnand %p610_p6, %p604_p3 }
  0x12   :  { %614 = shalt.err (!%p611_p7)
}
  0x13   :  { %s642_s20 = smov 64   ;;  %s643_s21 = smov 4  }
  0x14   :  { %31 = dma.hbm_to_vmem [thread:$0]  %s798_s1, 1600, %s26_s12, [#allocation4], %s642_s20, %s642_s20, %s643_s21  }
  0x15   :  { %637 = dma.done.wait [#allocation4], 1600  }
  0x16   :  { %638 = vsyncadd [#allocation4], 4294965696  ;;  %v644_v1 = vmov 0   ;;  %v645_v2 = vmov 0.0   ;;  %v569_v3 = vld [vmem:[#allocation3] sm:$0xff]   ;;  %v570_v4 = vld [vmem:[#allocation3 + $0x8] sm:$0xff]   ;;  %v412_v61 = vlaneseq }
  0x17   :  { %169 = vmatprep.subr.bf16.mxu0 %v644_v1  ;;  %525 = vmatprep.subr.bf16.mxu1 %v645_v2  ;;  %v571_v5 = vld [vmem:[#allocation3 + $0x10] sm:$0xff]   ;;  %v572_v6 = vld [vmem:[#allocation3 + $0x18] sm:$0xff]   ;;  %v51_v7 = vld [vmem:[%s797_s0 + $0x8] sm:$0xff]  ;;  %vm161_vm0 = vcmask 588800   ;;  %vm165_vm1 = vcmask 1043456   ;;  %vm274_vm2 = vcmask 1041408  }
  0x18   :  { %568 = vset.pattern.permute.xlu0 %v644_v1  ;;  %170 = vmatpush1.bf16.msra.mxu0 %v569_v3  ;;  %v573_v8 = vld [vmem:[#allocation3 + $0x20] sm:$0xff]   ;;  %v53_v9 = vpack.c.bf16 %v51_v7, %v51_v7  ;;  %v574_v12 = vld [vmem:[#allocation3 + $0x28] sm:$0xff]   ;;  %v575_v14 = vld [vmem:[#allocation3 + $0x30] sm:$0xff]   ;;  %vm646_vm3 = vmmov 0   ;;  %vm270_vm4 = vcmask 818176   ;;  %vm359_vm5 = vcmask 1040384  }
  0x19   :  { %171 = vmatprep.subr.bf16.mxu0 %v644_v1  ;;  %v582_v10 = vld [vmem:[%s800_s3] sm:$0xff]   ;;  %v583_v11 = vld [vmem:[%s800_s3 + $0x8] sm:$0xff]   ;;  %v584_v13 = vld [vmem:[%s800_s3 + $0x10] sm:$0xff]   ;;  %539 = vmatprep.mubr.msk.bf16.mxu1 %vm646_vm3, %v645_v2  ;;  %vm355_vm6 = vcmask 408576   ;;  %v413_v62 = vshrl.u32 %v412_v61, 7  ;;  %vm462_vm7 = vcmask 57344  }
  0x1a   :  { %493 = vmatprep.mubr.msk.bf16.mxu0 %vm161_vm0, %v53_v9  ;;  %526 = vmatpush3.bf16.msra.mxu1 %v582_v10  ;;  %v585_v15 = vld [vmem:[%s800_s3 + $0x18] sm:$0xff]   ;;  %v586_v17 = vld [vmem:[%s800_s3 + $0x20] sm:$0xff]   ;;  %v578_v19 = vld [vmem:[#allocation3 + $0x48] sm:$0xff]  }
  0x1b   :  { %527 = vmatprep.subr.bf16.mxu1 %v645_v2  ;;  %v576_v16 = vld [vmem:[#allocation3 + $0x38] sm:$0xff]   ;;  %v577_v18 = vld [vmem:[#allocation3 + $0x40] sm:$0xff]   ;;  %v579_v20 = vld [vmem:[#allocation3 + $0x50] sm:$0xff]   ;;  %v414_v63 = vsub.s32 0, %v413_v62 }
  0x1c   :  { %172 = vmatpush1.bf16.msra.mxu0 %v570_v4  ;;  %v580_v21 = vld [vmem:[#allocation3 + $0x58] sm:$0xff]   ;;  %v581_v22 = vld [vmem:[#allocation3 + $0x60] ss:$0 sps:$4 sm:$0xff]   ;;  %v587_v26 = vld [vmem:[%s800_s3 + $0x28] sm:$0xff]  }
  0x1d   :  { %173 = vmatprep.subr.bf16.mxu0 %v644_v1  ;;  %v50_v23 = vld [vmem:[%s797_s0] sm:$0xff]  ;;  %v167_v24 = vsel %vm165_vm1, %v581_v22, 0  ;;  %v588_v27 = vld [vmem:[%s800_s3 + $0x30] ss:$0 sps:$4 sm:$0x33]   ;;  %v590_v38 = vld [vmem:[%s802_s5 + $0x8] sm:$0xff]  }
  0x1e   :  { %528 = vmatpush3.bf16.msra.mxu1 %v583_v11  ;;  %v52_v25 = vpack.c.bf16 %v50_v23, %v50_v23  ;;  %v276_v28 = vsel %vm274_vm2, %v588_v27, 0  ;;  %v479_v29 = vld [vmem:[%s799_s2] ss:$0 sm:$0xff]  ;;  %v591_v39 = vld [vmem:[%s802_s5 + $0x10] sm:$0xff]  }
  0x1f   :  { %529 = vmatprep.subr.bf16.mxu1 %v645_v2  ;;  %v589_v36 = vld [vmem:[%s802_s5] sm:$0xff]   ;;  %v592_v40 = vld [vmem:[%s802_s5 + $0x18] ss:$0 sps:$4 sm:$0x11]  }
  0x20   :  { %174 = vmatpush1.bf16.msra.mxu0 %v571_v5  ;;  %v361_v41 = vsel %vm359_vm5, %v592_v40, 0  ;;  %v494_v42 = vld [vmem:[%s801_s4] ss:$0 sm:$0xff] }
  0x21   :  { %175 = vmatprep.subr.bf16.mxu0 %v644_v1  ;;  %v406_v50 = vld [vmem:[#allocation2] sm:$0x1] }
  0x22   :  { %530 = vmatpush3.bf16.msra.mxu1 %v584_v13  ;;  %409 = vperm.xlu0 %568, %v406_v50   ;;  %v503_v51 = vld [vmem:[%s803_s6] ss:$0 sm:$0xff]  ;;  %s647_s6 = smov [#allocation6]  }
  0x23   :  { %531 = vmatprep.subr.bf16.mxu1 %v645_v2  ;;  %v405_v60 = vld [vmem:[%s804_s7] sm:$0x1]  ;;  %s470_s29 = sshll.u32 %s647_s6, 4  ;;  %s471_s29 = int_to_ptr.vmem [resolvable:$true] %s470_s29 }
  0x24   :  { %176 = vmatpush1.bf16.msra.mxu0 %v572_v6  ;;  %s615_s30 = scalar_lea.vmem %s471_s29, 16  ;;  %s619_s7 = scalar_lea.vmem %s471_s29, 32 }
  0x25   :  { %177 = vmatprep.subr.bf16.mxu0 %v644_v1  ;;  %p616_p8 = scmp.ne.s32.totalorder %s471_s29, %s615_s30  ;;  %p620_p9 = scmp.lt.s32.totalorder %s471_s29, %s471_s29 }
  0x26   :  { %532 = vmatpush3.bf16.msra.mxu1 %v585_v15  ;;  %p621_p10 = scmp.lt.s32.totalorder %s619_s7, %s615_s30 }
  0x27   :  { %533 = vmatprep.subr.bf16.mxu1 %v645_v2 }
  0x28   :  { %178 = vmatpush1.bf16.msra.mxu0 %v573_v8  ;;  %p622_p11 = por %p621_p10, %p620_p9 }
  0x29   :  { %179 = vmatprep.subr.bf16.mxu0 %v644_v1 }
  0x2a   :  { %534 = vmatpush3.bf16.msra.mxu1 %v586_v17  ;;  %p623_p12 = pnand %p622_p11, %p616_p8 }
  0x2b   :  { %535 = vmatprep.subr.bf16.mxu1 %v645_v2 }
  0x2c   :  { %180 = vmatpush1.bf16.msra.mxu0 %v574_v12 }
  0x2d   :  { %181 = vmatprep.subr.bf16.mxu0 %v644_v1 }
  0x2e   :  { %536 = vmatpush3.bf16.msra.mxu1 %v587_v26 }
  0x2f   :  { %537 = vmatprep.subr.bf16.mxu1 %v645_v2 }
  0x30   :  { %182 = vmatpush1.bf16.msra.mxu0 %v575_v14 }
  0x31   :  { %183 = vmatprep.subr.bf16.mxu0 %v644_v1 }
  0x32   :  { %538 = vmatpush3.bf16.msra.mxu1 %v276_v28 }
  0x33   :  { %543 = vmatprep.subr.bf16.mxu1 %v645_v2 }
  0x34   :  { %184 = vmatpush1.bf16.msra.mxu0 %v576_v16 }
  0x35   :  { %185 = vmatprep.subr.bf16.mxu0 %v644_v1 }
  0x38   :  { %186 = vmatpush1.bf16.msra.mxu0 %v577_v18 }
  0x39   :  { %187 = vmatprep.subr.bf16.mxu0 %v644_v1 }
  0x3c   :  { %188 = vmatpush1.bf16.msra.mxu0 %v578_v19 }
  0x3d   :  { %189 = vmatprep.subr.bf16.mxu0 %v644_v1 }
  0x40   :  { %190 = vmatpush1.bf16.msra.mxu0 %v579_v20 }
  0x41   :  { %191 = vmatprep.subr.bf16.mxu0 %v644_v1 }
  0x44   :  { %192 = vmatpush1.bf16.msra.mxu0 %v580_v21 }
  0x45   :  { %193 = vmatprep.subr.bf16.mxu0 %v644_v1 }
  0x48   :  { %194 = vmatpush1.bf16.msra.mxu0 %v167_v24 }
  0x4b   :  { %202 = vmatmul.mubr.bf16.vlgmr.msra.gmra.mrb[0].mxu0 %v52_v25 }
  0xa1   :  { %v410_v0 = vpop.permute.xlu0 %409 }
  0xa2   :  { %v415_v1 = vrot.slane %v410_v0, %v414_v63 }
 0x11e   :  { %v203_v30 = vpop.f32.mrb[0].mxu0 }
 0x11f   :  { %v204_v31 = vadd.f32 %v479_v29, %v203_v30  ;;  %v205_v32 = vpop.f32.mrb[1].mxu0 }
 0x120   :  { %v206_v33 = vpop.f32.mrb[2].mxu0 }
 0x121   :  { %v209_v34 = vmax.f32 %v204_v31, 0.0  ;;  %v207_v35 = vpop.f32.mrb[3].mxu0 }
 0x123   :  { %v210_v37 = vpack.c.bf16 %v209_v34, %v209_v34 }
 0x125   :  { %540 = vmatmul.mubr.msk.bf16.vlgmr.msra.gmra.mrb[0].mxu1 %vm270_vm4, %v210_v37 }
 0x126   :  { %544 = vmatpush3.bf16.msra.mxu1 %v589_v36  ;;  %551 = vmatprep.mubr.msk.bf16.mxu1 %vm646_vm3, %v645_v2 }
 0x127   :  { %545 = vmatprep.subr.bf16.mxu1 %v645_v2 }
 0x12a   :  { %546 = vmatpush3.bf16.msra.mxu1 %v590_v38 }
 0x12b   :  { %547 = vmatprep.subr.bf16.mxu1 %v645_v2 }
 0x12e   :  { %548 = vmatpush3.bf16.msra.mxu1 %v591_v39 }
 0x12f   :  { %549 = vmatprep.subr.bf16.mxu1 %v645_v2 }
 0x132   :  { %550 = vmatpush3.bf16.msra.mxu1 %v361_v41 }
 0x133   :  { %555 = vmatprep.subr.bf16.mxu1 %v645_v2 }
 0x1f8   :  { %v312_v43 = vpop.f32.mrb[0].mxu1 }
 0x1f9   :  { %v313_v44 = vadd.f32 %v494_v42, %v312_v43  ;;  %v541_v45 = vpop.f32.mrb[1].mxu1 }
 0x1fa   :  { %v315_v46 = vpop.f32.mrb[2].mxu1 }
 0x1fb   :  { %v318_v47 = vmax.f32 %v313_v44, 0.0  ;;  %v542_v48 = vpop.f32.mrb[3].mxu1 }
 0x1fd   :  { %v319_v49 = vpack.c.bf16 %v318_v47, %v318_v47 }
 0x1ff   :  { %552 = vmatmul.mubr.msk.bf16.vlgmr.msra.gmra.mrb[4].mxu1 %vm355_vm6, %v319_v49 }
 0x200   :  { %557 = vmatprep.mubr.msk.bf16.mxu1 %vm646_vm3, %v645_v2 }
 0x2d2   :  { %v397_v52 = vpop.f32.mrb[4].mxu1 }
 0x2d3   :  { %v398_v53 = vadd.f32 %v503_v51, %v397_v52  ;;  %v553_v54 = vpop.f32.mrb[5].mxu1 }
 0x2d4   :  { %v400_v55 = vpop.f32.mrb[6].mxu1 }
 0x2d5   :  { %v403_v56 = vmax.f32 %v398_v53, 0.0  ;;  %v554_v57 = vpop.f32.mrb[7].mxu1 }
 0x2d7   :  { %v404_v58 = vpack.c.bf16 %v403_v56, %v403_v56 }
 0x2d9   :  { %v420_v59 = vsel %vm355_vm6, %v404_v58, 0 }
 0x2da   :  { %556 = vmatpush3.bf16.xpose.msra.mxu1 %v420_v59 }
 0x2e1   :  { %558 = vmatmul.mubr.msk.bf16.vlgmr.msra.gmra.mrb[8].mxu1 %vm355_vm6, %v405_v60 }
 0x3b4   :  { %v456_v2 = vpop.f32.mrb[8].mxu1 }
 0x3b5   :  { %v457_v3 = vadd.f32 %v456_v2, %v415_v1  ;;  %v559_v4 = vpop.f32.mrb[9].mxu1 }
 0x3b6   :  { %v459_v5 = vpop.f32.mrb[10].mxu1 }
 0x3b7   :  { %v560_v6 = vpop.f32.mrb[11].mxu1  ;;  %463 = vst.msk [vmem:[#allocation6] sm:$0x1] %vm462_vm7, %v457_v3 }
 0x3b8   :  { %626 = shalt.err (!%p623_p12)
}
 0x3b9   :  { %s627_s12 = scalar_lea.hbm %s806_s9, 16 }
 0x3ba   :  { %p628_p13 = scmp.ne.s32.totalorder %s806_s9, %s627_s12  ;;  %p631_p0 = scmp.lt.u32.totalorder %s627_s12, %s806_s9 }
 0x3bc   :  { %p633_p1 = pnand %p631_p0, %p628_p13 }
 0x3be   :  { %636 = shalt.err (!%p633_p1)
}
 0x3bf   :  { %473 = dma.vmem_to_hbm [thread:$0]  %s471_s29, 16, %s806_s9, [#allocation5]  }
 0x3c0   :  { %639 = dma.done.wait [#allocation5], 16  }
 0x3c1   :  { %640 = vsyncadd [#allocation5], 4294967280 }
 0x3c2   :  { %477 = vsyncpa [#allocation4], 1 }
 0x3c3   :  { %478 = vsyncpa [#allocation5], 1 }

</bundles_post_ra>
